<compile_context>
chip_gen: v7x
topology: tpu7x:2x2x1
jax: 0.10.0
libtpu: 0.0.40
codegen_flags: <defaults>
</compile_context>

<pallas_src>
import math

import jax
import jax.numpy as jnp
from jax.experimental import pallas as pl
from jax.experimental.pallas import tpu as pltpu


def _hidden_sharing_kernel(wu_sum_ref, wl_sum_ref, up_ref, low_ref,
                           out_up_ref, out_low_ref):
    # wu_sum_ref / wl_sum_ref : (L,) float32 in SMEM (column sums of Wu / Wl)
    # up_ref / low_ref        : (L, B, R) in VMEM (native layout)
    # out_*_ref               : (L, B, R) in VMEM
    L = up_ref.shape[0]

    up = up_ref[...]      # (L, B, R)
    low = low_ref[...]    # (L, B, R)

    # add_on[b, r] = sum_l upper[l,b,r] * colsum(Wu)[l] + lower[l,b,r] * colsum(Wl)[l]
    add_on = up[0] * wu_sum_ref[0] + low[0] * wl_sum_ref[0]
    for l in range(1, L):  # L is tiny; fully unrolled VPU accumulate
        add_on = add_on + up[l] * wu_sum_ref[l] + low[l] * wl_sum_ref[l]

    add_on = add_on[None]  # (1, B, R), broadcasts over L

    out_up_ref[...] = (up + add_on).astype(out_up_ref.dtype)
    out_low_ref[...] = (low + add_on).astype(out_low_ref.dtype)


@jax.jit
def hidden_sharing(upper, lower, wu, wl):
    """upper, lower: (L, B, R) float32; wu, wl: (R, L) (PyTorch nn.Linear weight)."""
    L, B, R = upper.shape

    # Precompute column sums of the projection weights (length-L vectors).
    wu_sum = jnp.sum(wu, axis=0).astype(jnp.float32)  # (L,)
    wl_sum = jnp.sum(wl, axis=0).astype(jnp.float32)  # (L,)

    out_up, out_low = pl.pallas_call(
        _hidden_sharing_kernel,
        in_specs=[
            pl.BlockSpec(memory_space=pltpu.MemorySpace.SMEM),   # wu_sum
            pl.BlockSpec(memory_space=pltpu.MemorySpace.SMEM),   # wl_sum
            pl.BlockSpec(memory_space=pltpu.MemorySpace.VMEM),   # upper (L,B,R)
            pl.BlockSpec(memory_space=pltpu.MemorySpace.VMEM),   # lower (L,B,R)
        ],
        out_specs=[
            pl.BlockSpec(memory_space=pltpu.MemorySpace.VMEM),
            pl.BlockSpec(memory_space=pltpu.MemorySpace.VMEM),
        ],
        out_shape=[
            jax.ShapeDtypeStruct((L, B, R), upper.dtype),
            jax.ShapeDtypeStruct((L, B, R), lower.dtype),
        ],
    )(wu_sum, wl_sum, upper, lower)

    return out_up, out_low


def _reference(upper, lower, wu, wl):
    """Faithful JAX port of the PyTorch forward (matmul + reduce path)."""
    up_p = jnp.transpose(upper, (1, 2, 0))                # (B, R, L)
    low_p = jnp.transpose(lower, (1, 2, 0))               # (B, R, L)
    u = jnp.einsum('brl,jl->brj', up_p, wu)               # (B, R, R)
    l = jnp.einsum('brl,jl->brj', low_p, wl)               # (B, R, R)
    add_on = jnp.sum(u + l, axis=2)[None]                 # (1, B, R)
    upper_out = jnp.transpose(up_p, (2, 0, 1)) + add_on   # (L, B, R)
    lower_out = jnp.transpose(low_p, (2, 0, 1)) + add_on  # (L, B, R)
    return upper_out, lower_out


if __name__ == "__main__":
    num_layers = 4
    batch = 2
    rnn_size = 32

    key = jax.random.PRNGKey(0)
    k_up, k_low, k_wu, k_wl = jax.random.split(key, 4)

    upper = jax.random.normal(k_up, (num_layers, batch, rnn_size), jnp.float32)
    lower = jax.random.normal(k_low, (num_layers, batch, rnn_size), jnp.float32)

    # nn.Linear(num_layers, rnn_size, bias=False): weight (rnn_size, num_layers),
    # init U(-1/sqrt(in), 1/sqrt(in)) like PyTorch.
    bound = 1.0 / math.sqrt(num_layers)
    wu = jax.random.uniform(k_wu, (rnn_size, num_layers), jnp.float32,
                            minval=-bound, maxval=bound)
    wl = jax.random.uniform(k_wl, (rnn_size, num_layers), jnp.float32,
                            minval=-bound, maxval=bound)

    up_out, low_out = jax.block_until_ready(hidden_sharing(upper, lower, wu, wl))

    ref_up, ref_low = _reference(upper, lower, wu, wl)
    assert up_out.shape == (num_layers, batch, rnn_size)
    assert low_out.shape == (num_layers, batch, rnn_size)
    # Summation order differs from the matmul reference (colsum rewrite), so
    # allow f32 reassociation-level tolerance.
    assert jnp.allclose(up_out, ref_up, atol=1e-4, rtol=1e-5)
    assert jnp.allclose(low_out, ref_low, atol=1e-4, rtol=1e-5)

    print("KERNEL_OK")
</pallas_src>

<mosaic_0001>
module attributes {stable_mosaic.version = 11 : i64} {
  func.func @_hidden_sharing_kernel(%arg0: memref<4xf32, #tpu.memory_space<smem>>, %arg1: memref<4xf32, #tpu.memory_space<smem>>, %arg2: memref<4x2x32xf32, #tpu.memory_space<vmem>>, %arg3: memref<4x2x32xf32, #tpu.memory_space<vmem>>, %arg4: memref<4x2x32xf32, #tpu.memory_space<vmem>>, %arg5: memref<4x2x32xf32, #tpu.memory_space<vmem>>) attributes {dimension_semantics = [], scalar_prefetch = 0 : i64, scratch_operands = 0 : i64, tpu.core_type = #tpu.core_type<tc>} {
    %c0 = arith.constant 0 : index
    %c0_0 = arith.constant 0 : index
    %c0_1 = arith.constant 0 : index
    %0 = vector.load %arg2[%c0, %c0_0, %c0_1] : memref<4x2x32xf32, #tpu.memory_space<vmem>>, vector<4x2x32xf32>
    %c0_2 = arith.constant 0 : index
    %c0_3 = arith.constant 0 : index
    %c0_4 = arith.constant 0 : index
    %1 = vector.load %arg3[%c0_2, %c0_3, %c0_4] : memref<4x2x32xf32, #tpu.memory_space<vmem>>, vector<4x2x32xf32>
    %2 = vector.extract_strided_slice %0 {offsets = [0, 0, 0], sizes = [1, 2, 32], strides = [1, 1, 1]} : vector<4x2x32xf32> to vector<1x2x32xf32>
    %3 = vector.shape_cast %2 : vector<1x2x32xf32> to vector<2x32xf32>
    %c0_5 = arith.constant 0 : index
    %4 = memref.load %arg0[%c0_5] : memref<4xf32, #tpu.memory_space<smem>>
    %5 = vector.broadcast %4 : f32 to vector<2x32xf32>
    %6 = arith.mulf %3, %5 : vector<2x32xf32>
    %7 = vector.extract_strided_slice %1 {offsets = [0, 0, 0], sizes = [1, 2, 32], strides = [1, 1, 1]} : vector<4x2x32xf32> to vector<1x2x32xf32>
    %8 = vector.shape_cast %7 : vector<1x2x32xf32> to vector<2x32xf32>
    %c0_6 = arith.constant 0 : index
    %9 = memref.load %arg1[%c0_6] : memref<4xf32, #tpu.memory_space<smem>>
    %10 = vector.broadcast %9 : f32 to vector<2x32xf32>
    %11 = arith.mulf %8, %10 : vector<2x32xf32>
    %12 = arith.addf %6, %11 : vector<2x32xf32>
    %13 = vector.extract_strided_slice %0 {offsets = [1, 0, 0], sizes = [1, 2, 32], strides = [1, 1, 1]} : vector<4x2x32xf32> to vector<1x2x32xf32>
    %14 = vector.shape_cast %13 : vector<1x2x32xf32> to vector<2x32xf32>
    %c1 = arith.constant 1 : index
    %15 = memref.load %arg0[%c1] : memref<4xf32, #tpu.memory_space<smem>>
    %16 = vector.broadcast %15 : f32 to vector<2x32xf32>
    %17 = arith.mulf %14, %16 : vector<2x32xf32>
    %18 = arith.addf %12, %17 : vector<2x32xf32>
    %19 = vector.extract_strided_slice %1 {offsets = [1, 0, 0], sizes = [1, 2, 32], strides = [1, 1, 1]} : vector<4x2x32xf32> to vector<1x2x32xf32>
    %20 = vector.shape_cast %19 : vector<1x2x32xf32> to vector<2x32xf32>
    %c1_7 = arith.constant 1 : index
    %21 = memref.load %arg1[%c1_7] : memref<4xf32, #tpu.memory_space<smem>>
    %22 = vector.broadcast %21 : f32 to vector<2x32xf32>
    %23 = arith.mulf %20, %22 : vector<2x32xf32>
    %24 = arith.addf %18, %23 : vector<2x32xf32>
    %25 = vector.extract_strided_slice %0 {offsets = [2, 0, 0], sizes = [1, 2, 32], strides = [1, 1, 1]} : vector<4x2x32xf32> to vector<1x2x32xf32>
    %26 = vector.shape_cast %25 : vector<1x2x32xf32> to vector<2x32xf32>
    %c2 = arith.constant 2 : index
    %27 = memref.load %arg0[%c2] : memref<4xf32, #tpu.memory_space<smem>>
    %28 = vector.broadcast %27 : f32 to vector<2x32xf32>
    %29 = arith.mulf %26, %28 : vector<2x32xf32>
    %30 = arith.addf %24, %29 : vector<2x32xf32>
    %31 = vector.extract_strided_slice %1 {offsets = [2, 0, 0], sizes = [1, 2, 32], strides = [1, 1, 1]} : vector<4x2x32xf32> to vector<1x2x32xf32>
    %32 = vector.shape_cast %31 : vector<1x2x32xf32> to vector<2x32xf32>
    %c2_8 = arith.constant 2 : index
    %33 = memref.load %arg1[%c2_8] : memref<4xf32, #tpu.memory_space<smem>>
    %34 = vector.broadcast %33 : f32 to vector<2x32xf32>
    %35 = arith.mulf %32, %34 : vector<2x32xf32>
    %36 = arith.addf %30, %35 : vector<2x32xf32>
    %37 = vector.extract_strided_slice %0 {offsets = [3, 0, 0], sizes = [1, 2, 32], strides = [1, 1, 1]} : vector<4x2x32xf32> to vector<1x2x32xf32>
    %38 = vector.shape_cast %37 : vector<1x2x32xf32> to vector<2x32xf32>
    %c3 = arith.constant 3 : index
    %39 = memref.load %arg0[%c3] : memref<4xf32, #tpu.memory_space<smem>>
    %40 = vector.broadcast %39 : f32 to vector<2x32xf32>
    %41 = arith.mulf %38, %40 : vector<2x32xf32>
    %42 = arith.addf %36, %41 : vector<2x32xf32>
    %43 = vector.extract_strided_slice %1 {offsets = [3, 0, 0], sizes = [1, 2, 32], strides = [1, 1, 1]} : vector<4x2x32xf32> to vector<1x2x32xf32>
    %44 = vector.shape_cast %43 : vector<1x2x32xf32> to vector<2x32xf32>
    %c3_9 = arith.constant 3 : index
    %45 = memref.load %arg1[%c3_9] : memref<4xf32, #tpu.memory_space<smem>>
    %46 = vector.broadcast %45 : f32 to vector<2x32xf32>
    %47 = arith.mulf %44, %46 : vector<2x32xf32>
    %48 = arith.addf %42, %47 : vector<2x32xf32>
    %49 = vector.shape_cast %48 : vector<2x32xf32> to vector<1x2x32xf32>
    %50 = vector.broadcast %49 : vector<1x2x32xf32> to vector<4x2x32xf32>
    %51 = arith.addf %0, %50 : vector<4x2x32xf32>
    %c0_10 = arith.constant 0 : index
    %c0_11 = arith.constant 0 : index
    %c0_12 = arith.constant 0 : index
    %52 = vector.load %arg4[%c0_10, %c0_11, %c0_12] : memref<4x2x32xf32, #tpu.memory_space<vmem>>, vector<4x2x32xf32>
    tpu.vector_store %arg4[%c0_10, %c0_11, %c0_12], %51 {strides = array<i32>} : memref<4x2x32xf32, #tpu.memory_space<vmem>>, vector<4x2x32xf32>,
    %53 = vector.broadcast %49 : vector<1x2x32xf32> to vector<4x2x32xf32>
    %54 = arith.addf %1, %53 : vector<4x2x32xf32>
    %c0_13 = arith.constant 0 : index
    %c0_14 = arith.constant 0 : index
    %c0_15 = arith.constant 0 : index
    %55 = vector.load %arg5[%c0_13, %c0_14, %c0_15] : memref<4x2x32xf32, #tpu.memory_space<vmem>>, vector<4x2x32xf32>
    tpu.vector_store %arg5[%c0_13, %c0_14, %c0_15], %54 {strides = array<i32>} : memref<4x2x32xf32, #tpu.memory_space<vmem>>, vector<4x2x32xf32>,
    return
  }
}

</mosaic_0001>

<bundles_post_ra>
// kernel: hidden_sharing.1
= control target key start
LH: loop header
LB: loop body
LE: loop exit
PB: predicated region body
PF: predicated region fallthrough
CT: control target
= control target key end

     0   :  { %11 = vsyncpa [#allocation5], 0  ;;  %s386_s0 = inlined_call_operand.vmem [shape: f32[4], index: 0, kind: input, shape index: {}]   ;;  %s387_s1 = inlined_call_operand.vmem [shape: f32[4], index: 1, kind: input, shape index: {}]   ;;  %s388_s2 = inlined_call_operand.vmem [shape: f32[4,2,32], index: 2, kind: input, shape index: {}]   ;;  %s389_s3 = inlined_call_operand.hbm [shape: f32[4,2,32], index: 3, kind: input, shape index: {}]   ;;  %s390_s4 = inlined_call_operand.hbm [shape: f32[4,2,32], index: 4, kind: output, shape index: {0}]   ;;  %s391_s5 = inlined_call_operand.hbm [shape: f32[4,2,32], index: 5, kind: output, shape index: {1}]  }
   0x1   :  { %12 = vsyncpa [#allocation7], 0 }
   0x2   :  { %13 = vsyncpa [#allocation3], 0 }
   0x3   :  { %14 = vsyncpa [#allocation4], 0 }
   0x4   :  { %15 = vsyncpa [#allocation11], 0  ;;  %s22_s20 = sshll.u32 %s386_s0, 4  ;;  %s32_s23 = sshll.u32 %s387_s1, 4  ;;  %s23_s20 = int_to_ptr.vmem [resolvable:$true] %s22_s20  ;;  %s33_s23 = int_to_ptr.vmem [resolvable:$true] %s32_s23 }
   0x5   :  { %s164_s24 = scalar_lea.vmem %s23_s20, 16  ;;  %p169_p1 = scmp.lt.s32.totalorder %s23_s20, %s23_s20 }
   0x6   :  { %p165_p0 = scmp.ne.s32.totalorder %s23_s20, %s164_s24  ;;  %p170_p2 = scmp.lt.s32.totalorder %s164_s24, %s164_s24 }
   0x8   :  { %p171_p3 = por %p170_p2, %p169_p1 }
   0xa   :  { %p172_p4 = pnand %p171_p3, %p165_p0 }
   0xc   :  { %175 = shalt.err (!%p172_p4)
}
   0xd   :  { %s264_s25 = smov [#allocation2]   ;;  %s176_s26 = scalar_lea.vmem %s33_s23, 16 }
   0xe   :  { %25 = dma.vmem_to_smem %s23_s20, 16, %s264_s25, [#allocation5]  }
   0xf   :  { %p177_p5 = scmp.ne.s32.totalorder %s33_s23, %s176_s26  ;;  %p181_p6 = scmp.lt.s32.totalorder %s33_s23, %s33_s23 }
  0x10   :  { %p182_p7 = scmp.lt.s32.totalorder %s176_s26, %s176_s26 }
  0x12   :  { %p183_p8 = por %p182_p7, %p181_p6 }
  0x14   :  { %p184_p9 = pnand %p183_p8, %p177_p5 }
  0x16   :  { %187 = shalt.err (!%p184_p9)
}
  0x17   :  { %s265_s0 = smov [#allocation6]   ;;  %s266_s1 = smov [#allocation8]  }
  0x18   :  { %35 = dma.vmem_to_smem %s33_s23, 16, %s265_s0, [#allocation7]  }
  0x19   :  { %s43_s27 = sshll.u32 %s266_s1, 4  ;;  %s188_s30 = scalar_lea.hbm %s389_s3, 128  ;;  %s44_s27 = int_to_ptr.vmem [resolvable:$true] %s43_s27 }
  0x1a   :  { %p189_p10 = scmp.ne.s32.totalorder %s389_s3, %s188_s30  ;;  %p192_p11 = scmp.lt.u32.totalorder %s188_s30, %s389_s3 }
  0x1c   :  { %p194_p12 = pnand %p192_p11, %p189_p10 }
  0x1e   :  { %197 = shalt.err (!%p194_p12)
}
  0x1f   :  { %s198_s10 = scalar_lea.vmem %s44_s27, 128  ;;  %p203_p0 = scmp.lt.s32.totalorder %s44_s27, %s44_s27 }
  0x20   :  { %p199_p13 = scmp.ne.s32.totalorder %s44_s27, %s198_s10  ;;  %p204_p1 = scmp.lt.s32.totalorder %s198_s10, %s198_s10 }
  0x22   :  { %p205_p2 = por %p204_p1, %p203_p0 }
  0x24   :  { %p206_p3 = pnand %p205_p2, %p199_p13 }
  0x26   :  { %209 = shalt.err (!%p206_p3)
}
  0x27   :  { %s267_s11 = smov 32   ;;  %s268_s12 = smov 2  }
  0x28   :  { %49 = dma.hbm_to_vmem [thread:$0]  %s389_s3, 128, %s44_s27, [#allocation3], %s267_s11, %s267_s11, %s268_s12  }
  0x29   :  { %254 = dma.done.wait [#allocation5], 16  }
  0x2a   :  { %255 = vsyncadd [#allocation5], 4294967280 }
  0x2b   :  { %256 = dma.done.wait [#allocation7], 16  }
  0x2c   :  { %257 = vsyncadd [#allocation7], 4294967280 }
  0x2d   :  { %258 = dma.done.wait [#allocation3], 128  }
  0x2e   :  { %259 = vsyncadd [#allocation3], 4294967168 }
  0x2f   :  { %59 = sfence }
  0x30   :  { %s68_s15 = sld [smem:[#allocation2]]  ;;  %s151_s17 = sld [smem:[#allocation2 + $0x1]]  ;;  %v60_v0 = vld [vmem:[%s388_s2] sm:$0x3]  ;;  %v61_v1 = vld [vmem:[%s388_s2 + $0x2] sm:$0x3] }
  0x31   :  { %s71_s16 = sld [smem:[#allocation6]]  ;;  %s152_s18 = sld [smem:[#allocation6 + $0x1]]  ;;  %v64_v2 = vld [vmem:[#allocation8] sm:$0x3]  ;;  %v65_v4 = vld [vmem:[#allocation8 + $0x2] sm:$0x3] }
  0x32   :  { %s153_s19 = sld [smem:[#allocation2 + $0x2]]  ;;  %s155_s3 = sld [smem:[#allocation2 + $0x3]]  ;;  %v62_v11 = vld [vmem:[%s388_s2 + $0x4] sm:$0x3]  ;;  %v63_v19 = vld [vmem:[%s388_s2 + $0x6] sm:$0x3] }
  0x33   :  { %s154_s20 = sld [smem:[#allocation6 + $0x2]]  ;;  %s156_s25 = sld [smem:[#allocation6 + $0x3]]  ;;  %v66_v15 = vld [vmem:[#allocation8 + $0x4] sm:$0x3]  ;;  %v67_v23 = vld [vmem:[#allocation8 + $0x6] sm:$0x3] }
  0x34   :  { %s269_s28 = smov [#allocation9]   ;;  %s270_s30 = smov [#allocation10]   ;;  %vm103_vm0 = vcmask 254976  }
  0x35   :  { %s121_s29 = sshll.u32 %s269_s28, 4  ;;  %s133_s6 = sshll.u32 %s270_s30, 4  ;;  %s334_s29 = int_to_ptr.vmem [resolvable:$true] %s121_s29  ;;  %s336_s6 = int_to_ptr.vmem [resolvable:$true] %s133_s6 }
  0x36   :  { %v69_v3 = vstv %s68_s15  ;;  %v76_v7 = vstv %s151_s17  ;;  %s210_s2 = scalar_lea.vmem %s334_s29, 128  ;;  %p215_p5 = scmp.lt.s32.totalorder %s334_s29, %s334_s29 }
  0x37   :  { %v70_v5 = vmul.f32 %v69_v3, %v60_v0  ;;  %v72_v6 = vstv %s71_s16  ;;  %v77_v9 = vmul.f32 %v76_v7, %v61_v1  ;;  %v80_v10 = vstv %s152_s18  ;;  %p211_p4 = scmp.ne.s32.totalorder %s334_s29, %s210_s2  ;;  %p216_p6 = scmp.lt.s32.totalorder %s210_s2, %s210_s2 }
  0x38   :  { %v73_v8 = vmul.f32 %v72_v6, %v64_v2  ;;  %v84_v12 = vstv %s153_s19  ;;  %v81_v14 = vmul.f32 %v80_v10, %v65_v4  ;;  %v92_v20 = vstv %s155_s3 }
  0x39   :  { %v88_v16 = vstv %s154_s20  ;;  %v85_v18 = vmul.f32 %v84_v12, %v62_v11  ;;  %v96_v24 = vstv %s156_s25  ;;  %v93_v26 = vmul.f32 %v92_v20, %v63_v19  ;;  %p217_p7 = por %p216_p6, %p215_p5 }
  0x3a   :  { %v74_v13 = vadd.f32 %v73_v8, %v70_v5  ;;  %v89_v22 = vmul.f32 %v88_v16, %v66_v15  ;;  %v97_v28 = vmul.f32 %v96_v24, %v67_v23 }
  0x3b   :  { %p218_p8 = pnand %p217_p7, %p211_p4 }
  0x3c   :  { %v78_v17 = vadd.f32 %v77_v9, %v74_v13 }
  0x3e   :  { %v82_v21 = vadd.f32 %v81_v14, %v78_v17 }
  0x40   :  { %v86_v25 = vadd.f32 %v85_v18, %v82_v21 }
  0x42   :  { %v90_v27 = vadd.f32 %v89_v22, %v86_v25 }
  0x44   :  { %v94_v29 = vadd.f32 %v93_v26, %v90_v27 }
  0x46   :  { %v98_v30 = vadd.f32 %v97_v28, %v94_v29 }
  0x48   :  { %v99_v31 = vadd.f32 %v98_v30, %v60_v0  ;;  %v100_v32 = vadd.f32 %v98_v30, %v61_v1  ;;  %v101_v33 = vadd.f32 %v98_v30, %v62_v11  ;;  %v102_v34 = vadd.f32 %v98_v30, %v63_v19 }
  0x49   :  { %v108_v35 = vadd.f32 %v98_v30, %v64_v2  ;;  %v109_v36 = vadd.f32 %v98_v30, %v65_v4  ;;  %v110_v37 = vadd.f32 %v98_v30, %v66_v15  ;;  %v111_v38 = vadd.f32 %v98_v30, %v67_v23 }
  0x4a   :  { %104 = vst.msk [vmem:[#allocation9] sm:$0x3] %vm103_vm0, %v99_v31  ;;  %105 = vst.msk [vmem:[#allocation9 + $0x2] sm:$0x3] %vm103_vm0, %v100_v32 }
  0x4b   :  { %106 = vst.msk [vmem:[#allocation9 + $0x4] sm:$0x3] %vm103_vm0, %v101_v33  ;;  %107 = vst.msk [vmem:[#allocation9 + $0x6] sm:$0x3] %vm103_vm0, %v102_v34 }
  0x4c   :  { %112 = vst.msk [vmem:[#allocation10] sm:$0x3] %vm103_vm0, %v108_v35  ;;  %113 = vst.msk [vmem:[#allocation10 + $0x2] sm:$0x3] %vm103_vm0, %v109_v36 }
  0x4d   :  { %114 = vst.msk [vmem:[#allocation10 + $0x4] sm:$0x3] %vm103_vm0, %v110_v37  ;;  %115 = vst.msk [vmem:[#allocation10 + $0x6] sm:$0x3] %vm103_vm0, %v111_v38 }
  0x4e   :  { %221 = shalt.err (!%p218_p8)
}
  0x4f   :  { %s222_s9 = scalar_lea.hbm %s390_s4, 128 }
  0x50   :  { %p223_p9 = scmp.ne.s32.totalorder %s390_s4, %s222_s9  ;;  %p226_p10 = scmp.lt.u32.totalorder %s222_s9, %s390_s4 }
  0x52   :  { %p228_p11 = pnand %p226_p10, %p223_p9 }
  0x54   :  { %231 = shalt.err (!%p228_p11)
}
  0x55   :  { %127 = dma.vmem_to_hbm [thread:$0]  %s334_s29, 128, %s390_s4, [#allocation4], %s267_s11, %s267_s11, %s268_s12  }
  0x56   :  { %s232_s18 = scalar_lea.vmem %s336_s6, 128  ;;  %p237_p13 = scmp.lt.s32.totalorder %s336_s6, %s336_s6 }
  0x57   :  { %p233_p12 = scmp.ne.s32.totalorder %s336_s6, %s232_s18  ;;  %p238_p0 = scmp.lt.s32.totalorder %s232_s18, %s232_s18 }
  0x59   :  { %p239_p1 = por %p238_p0, %p237_p13 }
  0x5b   :  { %p240_p2 = pnand %p239_p1, %p233_p12 }
  0x5d   :  { %243 = shalt.err (!%p240_p2)
}
  0x5e   :  { %s244_s21 = scalar_lea.hbm %s391_s5, 128 }
  0x5f   :  { %p245_p3 = scmp.ne.s32.totalorder %s391_s5, %s244_s21  ;;  %p248_p4 = scmp.lt.u32.totalorder %s244_s21, %s391_s5 }
  0x61   :  { %p250_p5 = pnand %p248_p4, %p245_p3 }
  0x63   :  { %253 = shalt.err (!%p250_p5)
}
  0x64   :  { %139 = dma.vmem_to_hbm [thread:$0]  %s336_s6, 128, %s391_s5, [#allocation11], %s267_s11, %s267_s11, %s268_s12  }
  0x65   :  { %260 = dma.done.wait [#allocation4], 128  }
  0x66   :  { %261 = vsyncadd [#allocation4], 4294967168 }
  0x67   :  { %262 = dma.done.wait [#allocation11], 128  }
  0x68   :  { %263 = vsyncadd [#allocation11], 4294967168 }
  0x69   :  { %146 = vsyncpa [#allocation3], 1 }
  0x6a   :  { %147 = vsyncpa [#allocation4], 1 }
  0x6b   :  { %148 = vsyncpa [#allocation11], 1 }
  0x6c   :  { %149 = vsyncpa [#allocation5], 1 }
  0x6d   :  { %150 = vsyncpa [#allocation7], 1 }

</bundles_post_ra>
